<compile_context>
chip_gen: v6e
topology: v6e:2x2x1
jax: 0.10.0
libtpu: 0.0.40
codegen_flags: <defaults>
</compile_context>

<pallas_src>
import functools

import jax
import jax.numpy as jnp
from jax.experimental import pallas as pl
from jax.experimental.pallas import tpu as pltpu


def _round_up(n, m):
    return ((n + m - 1) // m) * m


def _actor_sigmoid_kernel(x_ref, w_ref, b_ref, o_ref, *, max_action, action_dim):
    # MXU matmul (bf16 or f32 inputs, f32 accumulate) + f32 bias/sigmoid/scale
    # epilogue, all in VMEM.
    z = jnp.dot(x_ref[...], w_ref[...], preferred_element_type=jnp.float32)
    z = z + b_ref[...]
    # Only the real action columns are activated and stored; the lane padding
    # exists solely to feed the MXU, the output writeback is unpadded.
    a = max_action * jax.nn.sigmoid(z[:, :action_dim])
    # TODO(synk): once fused into a compute-bound kernel, switch the epilogue to
    # max_action * pl.reciprocal(1.0 + jnp.exp(-z), approx=True) so both exp and
    # the reciprocal land on the EUP slot.
    o_ref[...] = a.astype(o_ref.dtype)


def prepare_actor_params(weight_t, bias, *, matmul_dtype=jnp.bfloat16):
    """One-time parameter prep (call at parameter-load time, NOT per forward).

    weight_t: [state_dim, action_dim] (transposed vs nn.Linear's [out, in]).
    bias:     [action_dim].
    Pads the action (lane) dim of the weight up to a 128 multiple for the MXU
    and casts it to the matmul dtype; the bias stays f32 for the f32 epilogue.
    """
    state_dim, action_dim = weight_t.shape
    n_pad = _round_up(max(action_dim, 128), 128)
    w_pad = (
        jnp.zeros((state_dim, n_pad), matmul_dtype)
        .at[:, :action_dim]
        .set(weight_t.astype(matmul_dtype))
    )
    b_pad = (
        jnp.zeros((1, n_pad), jnp.float32)
        .at[0, :action_dim]
        .set(bias.astype(jnp.float32))
    )
    return w_pad, b_pad, action_dim


def actor_sigmoid(x, w_pad, b_pad, action_dim, max_action, *, target_tile_b=2048):
    """Forward: max_action * sigmoid(x @ W + b).

    x: [B, state_dim]; (w_pad, b_pad, action_dim) come from prepare_actor_params.
    Returns [B, action_dim] in x.dtype.
    """
    B, state_dim = x.shape
    n_pad = w_pad.shape[1]

    # Matmul inputs in the weight's dtype (bf16 halves the dominant x HBM read;
    # under jit the cast fuses into the upstream producer).  Accumulation and
    # the epilogue stay f32.
    x_in = x.astype(w_pad.dtype)

    # Batch tile: multiple of 8 sublanes; at least 2 grid steps whenever
    # possible so the "parallel" grid axis can use both v7x TensorCores; capped
    # at target_tile_b to keep VMEM modest while amortizing per-step overhead.
    tile_b = max(8, min(int(target_tile_b), _round_up(pl.cdiv(B, 2), 8)))
    grid = (pl.cdiv(B, tile_b),)

    kernel = functools.partial(
        _actor_sigmoid_kernel,
        max_action=float(max_action),  # baked constant; new value -> recompile
        action_dim=int(action_dim),
    )

    return pl.pallas_call(
        kernel,
        out_shape=jax.ShapeDtypeStruct((B, action_dim), x.dtype),
        grid_spec=pl.GridSpec(
            grid=grid,
            in_specs=[
                pl.BlockSpec((tile_b, state_dim), lambda i: (i, 0)),  # streamed
                pl.BlockSpec((state_dim, n_pad), lambda i: (0, 0)),   # resident
                pl.BlockSpec((1, n_pad), lambda i: (0, 0)),           # resident
            ],
            # Last block dim == full array extent -> unpadded output writeback
            # (action_dim * 4 B/row instead of 512 B/row), no wrapper slice.
            out_specs=pl.BlockSpec((tile_b, action_dim), lambda i: (i, 0)),
        ),
        compiler_params=pltpu.CompilerParams(
            # Batch tiles are independent -> megacore-shardable on v7x,
            # harmless on single-TC v5e/v6e.
            dimension_semantics=("parallel",),
        ),
    )(x_in, w_pad, b_pad)


if __name__ == "__main__":
    # Forward-implied shapes: state_dim=32, action_dim=8.
    state_dim, action_dim = 32, 8
    max_action = 2.0

    key = jax.random.PRNGKey(0)
    kx, kw, kb = jax.random.split(key, 3)

    # Deterministic init mimicking nn.Linear's uniform(-1/sqrt(in), 1/sqrt(in)).
    bound = 1.0 / jnp.sqrt(jnp.float32(state_dim))
    weight_t = jax.random.uniform(
        kw, (state_dim, action_dim), minval=-bound, maxval=bound, dtype=jnp.float32
    )
    bias = jax.random.uniform(
        kb, (action_dim,), minval=-bound, maxval=bound, dtype=jnp.float32
    )

    def reference(x):
        return max_action * jax.nn.sigmoid(x @ weight_t + bias[None, :])

    # Parameters are prepared ONCE (outside the per-call path).
    params_f32 = prepare_actor_params(weight_t, bias, matmul_dtype=jnp.float32)
    params_bf16 = prepare_actor_params(weight_t, bias, matmul_dtype=jnp.bfloat16)

    # Batches: normal case plus tail cases (B not a multiple of the tile, B=1).
    for B in (64, 100, 1):
        x = jax.random.normal(jax.random.fold_in(kx, B), (B, state_dim), dtype=jnp.float32)
        ref = reference(x)

        # Exact f32 path.
        w_pad, b_pad, adim = params_f32
        out32 = actor_sigmoid(x, w_pad, b_pad, adim, max_action)
        jax.block_until_ready(out32)
        assert out32.shape == (B, action_dim)
        assert jnp.allclose(out32, ref, atol=1e-5, rtol=1e-5)

        # bf16 matmul-input path (f32 accumulate/epilogue) — looser tolerance.
        w_pad, b_pad, adim = params_bf16
        out16 = actor_sigmoid(x, w_pad, b_pad, adim, max_action)
        jax.block_until_ready(out16)
        assert out16.shape == (B, action_dim)
        assert jnp.allclose(out16, ref, atol=2e-2, rtol=2e-2)

    print("KERNEL_OK")
</pallas_src>

<mosaic_0001>
module attributes {stable_mosaic.version = 11 : i64} {
  func.func @_actor_sigmoid_kernel(%arg0: i32, %arg1: memref<32x32xf32, #tpu.memory_space<vmem>>, %arg2: memref<32x128xf32, #tpu.memory_space<vmem>>, %arg3: memref<1x128xf32, #tpu.memory_space<vmem>>, %arg4: memref<32x8xf32, #tpu.memory_space<vmem>>) attributes {dimension_semantics = [#tpu.dimension_semantics<parallel>], iteration_bounds = array<i64: 2>, scalar_prefetch = 0 : i64, scratch_operands = 0 : i64, tpu.core_type = #tpu.core_type<tc>, window_params = [{transform_indices = @transform_0, window_bounds = array<i64: 32, 32>}, {pipeline_mode = #tpu.pipeline_mode<synchronous>, transform_indices = @transform_1, window_bounds = array<i64: 32, 128>}, {pipeline_mode = #tpu.pipeline_mode<synchronous>, transform_indices = @transform_2, window_bounds = array<i64: 1, 128>}, {transform_indices = @transform_3, window_bounds = array<i64: 32, 8>}]} {
    %c0 = arith.constant 0 : index
    %c0_0 = arith.constant 0 : index
    %0 = vector.load %arg1[%c0, %c0_0] : memref<32x32xf32, #tpu.memory_space<vmem>>, vector<32x32xf32>
    %c0_1 = arith.constant 0 : index
    %c0_2 = arith.constant 0 : index
    %1 = vector.load %arg2[%c0_1, %c0_2] : memref<32x128xf32, #tpu.memory_space<vmem>>, vector<32x128xf32>
    %cst = arith.constant dense<0.000000e+00> : vector<32x128xf32>
    %2 = tpu.matmul %0, %1, %cst {dimension_numbers = #tpu.dot_dimension_numbers<[1], [0], [0], [1], [0, 0, 1, 1], [], []>} : vector<32x32xf32>, vector<32x128xf32>, vector<32x128xf32> -> vector<32x128xf32>
    %c0_3 = arith.constant 0 : index
    %c0_4 = arith.constant 0 : index
    %3 = vector.load %arg3[%c0_3, %c0_4] : memref<1x128xf32, #tpu.memory_space<vmem>>, vector<1x128xf32>
    %4 = vector.broadcast %3 : vector<1x128xf32> to vector<32x128xf32>
    %5 = arith.addf %2, %4 : vector<32x128xf32>
    %6 = vector.extract_strided_slice %5 {offsets = [0, 0], sizes = [32, 8], strides = [1, 1]} : vector<32x128xf32> to vector<32x8xf32>
    %7 = arith.negf %6 : vector<32x8xf32>
    %8 = math.exp %7 : vector<32x8xf32>
    %cst_5 = arith.constant 1.000000e+00 : f32
    %9 = vector.broadcast %cst_5 : f32 to vector<32x8xf32>
    %10 = arith.addf %9, %8 : vector<32x8xf32>
    %11 = arith.divf %9, %10 : vector<32x8xf32>
    %cst_6 = arith.constant 2.000000e+00 : f32
    %12 = vector.broadcast %cst_6 : f32 to vector<32x8xf32>
    %13 = arith.mulf %12, %11 : vector<32x8xf32>
    %c0_7 = arith.constant 0 : index
    %c0_8 = arith.constant 0 : index
    %14 = vector.load %arg4[%c0_7, %c0_8] : memref<32x8xf32, #tpu.memory_space<vmem>>, vector<32x8xf32>
    tpu.vector_store %arg4[%c0_7, %c0_8], %13 {strides = array<i32>} : memref<32x8xf32, #tpu.memory_space<vmem>>, vector<32x8xf32>,
    return
  }
  func.func @transform_0(%arg0: i32) -> (i32, i32) {
    %c0_i32 = arith.constant 0 : i32
    %c0_i32_0 = arith.constant 0 : i32
    return %arg0, %c0_i32 : i32, i32
  }
  func.func @transform_1(%arg0: i32) -> (i32, i32) {
    %c0_i32 = arith.constant 0 : i32
    %c0_i32_0 = arith.constant 0 : i32
    %c0_i32_1 = arith.constant 0 : i32
    return %c0_i32, %c0_i32_0 : i32, i32
  }
  func.func @transform_2(%arg0: i32) -> (i32, i32) {
    %c0_i32 = arith.constant 0 : i32
    %c0_i32_0 = arith.constant 0 : i32
    %c0_i32_1 = arith.constant 0 : i32
    return %c0_i32, %c0_i32_0 : i32, i32
  }
  func.func @transform_3(%arg0: i32) -> (i32, i32) {
    %c0_i32 = arith.constant 0 : i32
    %c0_i32_0 = arith.constant 0 : i32
    return %arg0, %c0_i32 : i32, i32
  }
}

</mosaic_0001>

<bundles_post_ra>
// kernel: tpu_custom_call.1
= control target key start
LH: loop header
LB: loop body
LE: loop exit
PB: predicated region body
PF: predicated region fallthrough
CT: control target
= control target key end

     0   :  { %s478_s12 = smov 0   ;;  %s517_s0 = inlined_call_operand.vmem [shape: f32[64,32], index: 0, kind: input, shape index: {}]   ;;  %s518_s1 = inlined_call_operand.vmem [shape: f32[32,128], index: 1, kind: input, shape index: {}]   ;;  %s519_s2 = inlined_call_operand.vmem [shape: f32[1,128], index: 2, kind: input, shape index: {}]   ;;  %s520_s3 = inlined_call_operand.vmem [shape: f32[64,8], index: 3, kind: output, shape index: {}]  }
   0x1 LB: > { %s376_s13 = sadd.s32 4294967295, %s456_s12   ;;  %p380_p0 = scmp.ge.s32.totalorder %s456_s12, 1  ;;  %s456_s12 = sphi %s478_s12, %s13_s12  }
   0x2   : > { %p138_p1 = scmp.lt.s32.totalorder %s456_s12, 3 }
   0x4   : > { %p139_p2 = pnand %p380_p0, %p138_p1 }
   0x5   : > { %s381_s18 = sshll.u32 (!%p139_p2), %s376_s13, 2 }
   0x6   : > { %142 = sbr.rel (%p139_p2) target bundleno = 254 (0xfe), region = 32  ;;  %p163_p3 = scmp.lt.s32.totalorder (!%p139_p2), %s381_s18, 7 }
   0xb   : > { %v181_v0 = vld [vmem:[%s518_s1 + $0x18] sm:$0xff]  ;;  %v180_v1 = vld [vmem:[%s518_s1 + $0x10] sm:$0xff]  ;;  %v179_v2 = vld [vmem:[%s518_s1 + $0x8] sm:$0xff]  ;;  %s522_s18 = smov (!%p163_p3, %s381_s18), 7  ;;  %vm189_vm0 = vcmask 261120   ;;  %vm315_vm1 = vcmask 64512  }
   0xc   : > { %404 = vmatprep.subr.mxu0 %v181_v0  ;;  %418 = vmatprep.subr.mxu1 %v181_v0  ;;  %v178_v3 = vld [vmem:[%s518_s1] sm:$0xff]  ;;  %s382_s23 = sshll.u32 %s522_s18, 3 }
   0xd   : > { %405 = vmatpush3.msra.mxu0 %v181_v0  ;;  %422 = vmatpush3.msra.mxu1 %v181_v0  ;;  %s166_s26 = scalar_lea.vmem %s517_s0, %s382_s23  ;;  %v385_v8 = vld [vmem:[%s519_s2] ss:$0 sm:$0xff]  ;;  %s172_s4 = scalar_lea.vmem %s520_s3, %s382_s23 }
   0xe   : > { %406 = vmatprep.subr.mxu0 %v180_v1  ;;  %419 = vmatprep.subr.mxu1 %v180_v1  ;;  %v174_v4 = vld [vmem:[%s166_s26] sm:$0xff]  ;;  %v176_v5 = vld [vmem:[%s166_s26 + $0x10] sm:$0xff]  ;;  %v175_v6 = vld [vmem:[%s166_s26 + $0x8] sm:$0xff] }
   0xf   : > { %407 = vmatpush3.msra.mxu0 %v180_v1  ;;  %423 = vmatpush3.msra.mxu1 %v180_v1  ;;  %v177_v7 = vld [vmem:[%s166_s26 + $0x18] sm:$0xff] }
  0x10   : > { %408 = vmatprep.subr.mxu0 %v179_v2  ;;  %420 = vmatprep.subr.mxu1 %v179_v2 }
  0x11   : > { %409 = vmatpush3.msra.mxu0 %v179_v2  ;;  %424 = vmatpush3.msra.mxu1 %v179_v2 }
  0x12   : > { %410 = vmatprep.subr.mxu0 %v178_v3  ;;  %421 = vmatprep.subr.mxu1 %v178_v3 }
  0x13   : > { %411 = vmatpush3.msra.mxu0 %v178_v3  ;;  %425 = vmatpush3.msra.mxu1 %v178_v3 }
  0x14   : > { %412 = vmatprep.mubr.msk.f32.mxu0 %vm189_vm0, %v174_v4  ;;  %415 = vmatprep.mubr.msk.f32.mxu1 %vm189_vm0, %v176_v5 }
  0x15   : > { %413 = vmatmul.mubr.msk.f32.vlgmr.msra.gmra.mxu0 %vm189_vm0, %v175_v6  ;;  %416 = vmatmul.mubr.msk.f32.vlgmr.msra.gmra.mxu1 %vm189_vm0, %v177_v7 }
  0xd5   : > { %v414_v9 = vpop.f32.mrf.mxu0  ;;  %v417_v10 = vpop.f32.mrf.mxu1 }
  0xd6   : > { %v274_v11 = vadd.f32 %v414_v9, %v385_v8  ;;  %v284_v12 = vadd.f32 %v417_v10, %v385_v8 }
  0xd7   : > { %v268_v13 = vpop.f32.mrf.mxu0  ;;  %v278_v14 = vpop.f32.mrf.mxu1 }
  0xd8   : > { %v391_v15 = vmul.f32 -1.442695, %v274_v11  ;;  %v393_v16 = vmul.f32 -1.442695, %v284_v12  ;;  %v269_v17 = vadd.f32 %v385_v8, %v268_v13  ;;  %v279_v18 = vadd.f32 %v385_v8, %v278_v14 }
  0xda   : > { %434 = vpow2.f32 %v391_v15  ;;  %v390_v19 = vmul.f32 -1.442695, %v269_v17  ;;  %v392_v20 = vmul.f32 -1.442695, %v279_v18 }
  0xdb   : > { %436 = vpow2.f32 %v393_v16 }
  0xdc   : > { %438 = vpow2.f32 %v390_v19 }
  0xdd   : > { %440 = vpow2.f32 %v392_v20 }
  0xe7   : > { %v435_v21 = vpop.eup %434 }
  0xe8   : > { %v437_v22 = vpop.eup %436  ;;  %v300_v23 = vadd.f32 1.0, %v435_v21 }
  0xe9   : > { %v439_v24 = vpop.eup %438  ;;  %v302_v25 = vadd.f32 1.0, %v437_v22 }
  0xea   : > { %v441_v26 = vpop.eup %440  ;;  %442 = vrcp.f32 %v300_v23  ;;  %v299_v27 = vadd.f32 1.0, %v439_v24 }
  0xeb   : > { %444 = vrcp.f32 %v302_v25  ;;  %v301_v28 = vadd.f32 1.0, %v441_v26 }
  0xec   : > { %446 = vrcp.f32 %v299_v27 }
  0xed   : > { %448 = vrcp.f32 %v301_v28 }
  0xf7   : > { %v443_v29 = vpop.eup %442 }
  0xf8   : > { %v445_v30 = vpop.eup %444  ;;  %v312_v34 = vmul.f32 2.0, %v443_v29 }
  0xf9   : > { %v447_v31 = vpop.eup %446  ;;  %v314_v36 = vmul.f32 2.0, %v445_v30 }
  0xfa   : > { %v449_v32 = vpop.eup %448  ;;  %v311_v33 = vmul.f32 2.0, %v447_v31  ;;  %317 = vst.msk [vmem:[%s172_s4 + $0x8] sm:$0xff] %vm315_vm1, %v312_v34 }
  0xfb   : > { %v313_v35 = vmul.f32 2.0, %v449_v32  ;;  %319 = vst.msk [vmem:[%s172_s4 + $0x18] sm:$0xff] %vm315_vm1, %v314_v36 }
  0xfc   : > { %316 = vst.msk [vmem:[%s172_s4] sm:$0xff] %vm315_vm1, %v311_v33 }
  0xfd   : > { %318 = vst.msk [vmem:[%s172_s4 + $0x10] sm:$0xff] %vm315_vm1, %v313_v35 }
  0xfe PF: > { %s13_s12 = sadd.s32 1, %s456_s12  }
  0xff   : > { %p10_p4 = scmp.ge.s32.totalorder %s13_s12, 4  }
 0x101   :  { %12 = sbr.rel (!%p10_p4) target bundleno = 1 (0x1), region = 62 }

</bundles_post_ra>
